<compile_context>
chip_gen: v7x
topology: tpu7x:2x2x1
jax: 0.10.0
libtpu: 0.0.40
codegen_flags: <defaults>
</compile_context>

<pallas_src>
import functools

import jax
import jax.numpy as jnp
from jax.experimental import pallas as pl
from jax.experimental.pallas import tpu as pltpu

D_MODEL = 768      # hard-coded in the PyTorch file
Z_HIDDEN = 128     # z_extract bottleneck
T_STEPS = 1000     # self.T
VOCAB = 128        # synthetic vocab for the black-box encoder/decoder
PAD_ID = 0


def _round_up(x, m):
    return ((x + m - 1) // m) * m


def _seq_tile_cap():
    # 128 MiB VMEM (v5e/v6e) -> seq tile up to 512; 64 MiB (v7x) -> 256.
    try:
        vmem = pltpu.get_tpu_info().vmem_capacity_bytes
    except Exception:                      # conservative fallback
        vmem = 64 << 20
    return 512 if vmem >= (96 << 20) else 256


def _pick_seq_tile(s, cap):
    """Largest multiple-of-8 tile <= cap that divides the 8-padded seq len."""
    s_pad = _round_up(s, 8)
    ts = min(cap, s_pad)
    ts = (ts // 8) * 8
    while s_pad % ts:
        ts -= 8
    return ts, s_pad


# --------------------------------------------------------------------------
# Fused token path: hidden softmax + embedding-in-logit-space + mask +
# projection + CE partials.  One grid cell = one (branch*batch row, seq tile).
# --------------------------------------------------------------------------

def _fused_token_kernel(one_minus_a_ref, hid_ref, ids_ref, mask_ref, tgt_ref,
                        sl_ref, ew_ref, w_ref, b_ref, out_ref, *, pad_id):
    one_minus_a = one_minus_a_ref[0]                      # SMEM scalar

    # hidden softmax: bf16 stream -> f32 math; reciprocal-multiply
    # normalization (TS EUP rcp ops instead of TS*768 divides).
    h = hid_ref[...].astype(jnp.float32)                  # (TS, D)
    h = h - jnp.max(h, axis=-1, keepdims=True)
    eh = jnp.exp(h)
    inv = pl.reciprocal(jnp.sum(eh, axis=-1, keepdims=True), approx=True)
    p = eh * (one_minus_a * inv)                          # (1-a)*softmax(h)

    # logits = mask*(onehot@(E@W) + ((1-a)softmax(h))@W + a*softmax(s)@W) + b
    ids = ids_ref[...]                                    # (TS, 1) int32
    ts, vocab = ids.shape[0], ew_ref.shape[0]
    onehot = (jax.lax.broadcasted_iota(jnp.int32, (ts, vocab), 1) == ids)
    logits = (jnp.dot(onehot.astype(jnp.bfloat16), ew_ref[...],
                      preferred_element_type=jnp.float32)
              + jnp.dot(p.astype(jnp.bfloat16), w_ref[...],
                        preferred_element_type=jnp.float32)
              + sl_ref[...])                              # (TS, V) f32
    logits = logits * mask_ref[...] + b_ref[...]

    # cross-entropy partial sums with ignore_index = pad_id (f32 math)
    tgt = tgt_ref[...]                                    # (TS, 1) int32
    m = jnp.max(logits, axis=-1, keepdims=True)
    z = logits - m
    lse = jnp.log(jnp.sum(jnp.exp(z), axis=-1, keepdims=True))
    col = jax.lax.broadcasted_iota(jnp.int32, logits.shape, 1)
    picked_z = jnp.sum(jnp.where(col == tgt, z, 0.0), axis=-1, keepdims=True)
    valid = (tgt != pad_id).astype(jnp.float32)           # (TS, 1)
    total = -jnp.sum((picked_z - lse) * valid)
    count = jnp.sum(valid)

    # single lane-dense (8,128) partial block: row 0 = CE sum, row 1 = count
    row = jax.lax.broadcasted_iota(jnp.int32, (8, 128), 0)
    out_ref[...] = jnp.where(row == 0, total,
                             jnp.where(row == 1, count, 0.0))


def fused_decode_ce(a, sent_all, hidden_all, ids_all, mask_all, tgt_all,
                    dec_emb, dec_wout, dec_bout, pad_id):
    """Per-(branch,batch) CE partial sums & valid counts from one fused kernel.

    Inputs are the merged first+last branches stacked along axis 0 (G = 2B).
    Returns (tot_g, cnt_g) of shape (G,).
    """
    G, S = ids_all.shape
    D = hidden_all.shape[-1]
    V = dec_wout.shape[-1]

    TS, S_pad = _pick_seq_tile(S, _seq_tile_cap())
    NT = S_pad // TS
    pad = S_pad - S
    if pad:   # only when S is not a multiple of 8 (kept off the common path)
        hidden_all = jnp.pad(hidden_all, ((0, 0), (0, pad), (0, 0)))
        ids_all = jnp.pad(ids_all, ((0, 0), (0, pad)))
        mask_all = jnp.pad(mask_all, ((0, 0), (0, pad)))
        tgt_all = jnp.pad(tgt_all, ((0, 0), (0, pad)), constant_values=pad_id)

    a_f32 = jnp.asarray(a, jnp.float32).reshape(())

    # Hoisted per-row sentiment contribution in logit space (tiny, f32, XLA).
    sl = (a_f32 * jax.nn.softmax(sent_all.astype(jnp.float32), axis=-1)
          ) @ dec_wout.astype(jnp.float32)                 # (G, V)
    sl3 = sl.reshape(G, 1, V)

    # Fold the token embedding into logit space: EW = E @ W  (V x V, bf16).
    ew = (dec_emb.astype(jnp.float32) @ dec_wout.astype(jnp.float32)
          ).astype(jnp.bfloat16)

    hid3 = hidden_all.astype(jnp.bfloat16)                 # bf16 HBM stream
    ids3 = ids_all.reshape(G, S_pad, 1).astype(jnp.int32)
    mask3 = mask_all.reshape(G, S_pad, 1).astype(jnp.float32)
    tgt3 = tgt_all.reshape(G, S_pad, 1).astype(jnp.int32)

    kernel = functools.partial(_fused_token_kernel, pad_id=pad_id)

    part = pl.pallas_call(
        kernel,
        grid=(G, NT),
        out_shape=jax.ShapeDtypeStruct((G, NT, 8, 128), jnp.float32),
        in_specs=[
            pl.BlockSpec(memory_space=pltpu.MemorySpace.SMEM),      # (1-a)
            pl.BlockSpec((None, TS, D), lambda g, j: (g, j, 0)),    # hidden bf16
            pl.BlockSpec((None, TS, 1), lambda g, j: (g, j, 0)),    # token ids
            pl.BlockSpec((None, TS, 1), lambda g, j: (g, j, 0)),    # attn mask
            pl.BlockSpec((None, TS, 1), lambda g, j: (g, j, 0)),    # targets
            pl.BlockSpec((None, 1, V), lambda g, j: (g, 0, 0)),     # sent logits
            pl.BlockSpec((VOCAB, V), lambda g, j: (0, 0)),          # EW (resident)
            pl.BlockSpec((D, V), lambda g, j: (0, 0)),              # W  (resident)
            pl.BlockSpec((1, V), lambda g, j: (0, 0)),              # bias
        ],
        out_specs=pl.BlockSpec((None, None, 8, 128),
                               lambda g, j: (g, j, 0, 0)),
        compiler_params=pltpu.CompilerParams(
            dimension_semantics=("parallel", "parallel")),
    )((1.0 - a_f32).reshape(1), hid3, ids3, mask3, tgt3, sl3, ew,
      dec_wout.astype(jnp.bfloat16), dec_bout.astype(jnp.float32))

    tot_g = jnp.sum(part[:, :, 0, 0], axis=1)              # (G,)
    cnt_g = jnp.sum(part[:, :, 1, 0], axis=1)              # (G,)
    return tot_g, cnt_g


# --------------------------------------------------------------------------
# Synthetic encoder (the PyTorch module receives encoder/decoder injected;
# they are not part of Diffusion's own parameters) -- plain JAX glue.
# --------------------------------------------------------------------------

def encoder_apply(params, tokens, mask):
    emb = jnp.take(params["enc_emb"], tokens, axis=0)           # (G, S, D)
    hidden = emb                                                # hidden states
    m = mask.astype(jnp.float32)[..., None]
    pooled = jnp.sum(hidden * m, axis=1) / jnp.maximum(jnp.sum(m, axis=1), 1.0)
    sentiment = jnp.tanh(pooled @ params["enc_ws"] + params["enc_bs"])  # (G, D)
    return hidden, sentiment


# --------------------------------------------------------------------------
# Diffusion.forward (training branch, xT != None)
# --------------------------------------------------------------------------

def diffusion_forward(params, x0, xT, x0_mask, xT_mask, x0_out, xT_out, key):
    B, S = x0.shape

    # t ~ randint(0, T, (batch,))   (torch.randint -> jax.random.randint)
    t = jax.random.randint(key, (B,), 0, T_STEPS)

    # Stack the two branches BEFORE the encoder so the large (2B,S,D) hidden
    # buffer is produced already stacked (no post-hoc concatenate through HBM).
    ids_all = jnp.concatenate([x0, xT], axis=0)                      # (2B,S)
    mask_all = jnp.concatenate([x0_mask, xT_mask], axis=0)           # (2B,S)
    tgt_all = jnp.concatenate([x0_out, xT_out], axis=0)              # (2B,S)

    hidden_all, sent_all = encoder_apply(params, ids_all, mask_all)  # (2B,S,D)
    first_sent, last_sent = sent_all[:B], sent_all[B:]

    tot_g, cnt_g = fused_decode_ce(
        params["a"], sent_all, hidden_all, ids_all,
        mask_all.astype(jnp.float32), tgt_all,
        params["dec_emb"], params["dec_wout"], params["dec_bout"], PAD_ID)

    # per-branch mean (CrossEntropyLoss ignore_index semantics), guarded /0
    lm_loss = (jnp.sum(tot_g[:B]) / jnp.maximum(jnp.sum(cnt_g[:B]), 1.0)
               + jnp.sum(tot_g[B:]) / jnp.maximum(jnp.sum(cnt_g[B:]), 1.0))

    # Diffusion branch: tiny (B,768) MLP + MSE (~0.2 MFLOP).  Per the perf
    # review a standalone pallas_call here is pure launch/DMA overhead, so it
    # is left to XLA to fuse as plain JAX.
    delta_z = (last_sent - first_sent) / float(T_STEPS)
    # extract(T_cumsum, t) == arange(T)[t] == t  (no gather needed)
    # TODO(synk): if the real schedule were a genuine cumulative sum (not
    # arange), gather from that table here instead.
    t_c = t.reshape(B, 1).astype(jnp.float32)
    t_hidden = delta_z * t_c + first_sent
    h1 = jax.nn.relu(t_hidden @ params["z_w1"] + params["z_b1"])
    tilde_z = jax.nn.relu(h1 @ params["z_w2"] + params["z_b2"])
    diffusion_loss = jnp.mean((tilde_z - delta_z) ** 2)

    return lm_loss, diffusion_loss


# Pure-JAX reference of the same forward (for correctness check).
def reference_forward(params, x0, xT, x0_mask, xT_mask, x0_out, xT_out, key):
    B, S = x0.shape
    a = params["a"]
    t = jax.random.randint(key, (B,), 0, T_STEPS)

    def mix(sent, hid):
        return (a * jax.nn.softmax(sent[:, None, :], axis=-1)
                + (1.0 - a) * jax.nn.softmax(hid, axis=-1))

    def dec(ids, mask, enc_hidden):
        emb = jnp.take(params["dec_emb"], ids, axis=0)
        x = (emb + enc_hidden) * mask.astype(jnp.float32)[..., None]
        return x.reshape(-1, D_MODEL) @ params["dec_wout"] + params["dec_bout"]

    def ce(logits, tgt, pad):
        logp = jax.nn.log_softmax(logits, axis=-1)
        picked = jnp.take_along_axis(logp, tgt[:, None], axis=-1)[:, 0]
        valid = (tgt != pad).astype(jnp.float32)
        return -jnp.sum(picked * valid) / jnp.sum(valid)

    first_hidden, first_sent = encoder_apply(params, x0, x0_mask)
    last_hidden, last_sent = encoder_apply(params, xT, xT_mask)
    lm = (ce(dec(x0, x0_mask, mix(first_sent, first_hidden)),
             x0_out.reshape(-1), PAD_ID)
          + ce(dec(xT, xT_mask, mix(last_sent, last_hidden)),
               xT_out.reshape(-1), PAD_ID))
    delta_z = (last_sent - first_sent) / T_STEPS
    tc = jnp.take(jnp.arange(T_STEPS), t).reshape(B, 1).astype(jnp.float32)
    t_hidden = delta_z * tc + first_sent
    h1 = jax.nn.relu(t_hidden @ params["z_w1"] + params["z_b1"])
    tilde = jax.nn.relu(h1 @ params["z_w2"] + params["z_b2"])
    diff = jnp.mean((tilde - delta_z) ** 2)
    return lm, diff


# --------------------------------------------------------------------------
# Deterministic parameter init (shapes follow Diffusion.__init__)
# --------------------------------------------------------------------------

def init_params(key):
    ks = jax.random.split(key, 6)
    scale = 0.02
    return {
        # synthetic black-box encoder/decoder
        "enc_emb": scale * jax.random.normal(ks[0], (VOCAB, D_MODEL), jnp.float32),
        "enc_ws": scale * jax.random.normal(ks[1], (D_MODEL, D_MODEL), jnp.float32),
        "enc_bs": jnp.zeros((D_MODEL,), jnp.float32),
        "dec_emb": scale * jax.random.normal(ks[2], (VOCAB, D_MODEL), jnp.float32),
        "dec_wout": scale * jax.random.normal(ks[3], (D_MODEL, VOCAB), jnp.float32),
        "dec_bout": jnp.zeros((1, VOCAB), jnp.float32),
        # Diffusion's own parameters
        "z_w1": scale * jax.random.normal(ks[4], (D_MODEL, Z_HIDDEN), jnp.float32),
        "z_b1": jnp.zeros((1, Z_HIDDEN), jnp.float32),
        "z_w2": scale * jax.random.normal(ks[5], (Z_HIDDEN, D_MODEL), jnp.float32),
        "z_b2": jnp.zeros((1, D_MODEL), jnp.float32),
        "a": jnp.array([0.5], jnp.float32),                 # nn.Parameter([0.5])
    }


if __name__ == "__main__":
    key = jax.random.PRNGKey(0)
    kp, kx0, kxT, ko0, koT, kt = jax.random.split(key, 6)
    params = init_params(kp)

    B, S = 2, 8
    x0 = jax.random.randint(kx0, (B, S), 1, VOCAB)
    xT = jax.random.randint(kxT, (B, S), 1, VOCAB)
    x0_mask = jnp.ones((B, S), jnp.int32)
    xT_mask = jnp.ones((B, S), jnp.int32)
    # targets; last position padded to exercise ignore_index
    x0_out = jax.random.randint(ko0, (B, S), 0, VOCAB).at[:, -1].set(PAD_ID)
    xT_out = jax.random.randint(koT, (B, S), 0, VOCAB).at[:, -1].set(PAD_ID)

    lm_loss, diffusion_loss = jax.jit(diffusion_forward)(
        params, x0, xT, x0_mask, xT_mask, x0_out, xT_out, kt)
    jax.block_until_ready((lm_loss, diffusion_loss))

    lm_ref, diff_ref = jax.jit(reference_forward)(
        params, x0, xT, x0_mask, xT_mask, x0_out, xT_out, kt)
    jax.block_until_ready((lm_ref, diff_ref))

    assert jnp.isfinite(lm_loss) and jnp.isfinite(diffusion_loss)
    assert jnp.allclose(lm_loss, lm_ref, rtol=5e-2, atol=1e-4), (lm_loss, lm_ref)
    assert jnp.allclose(diffusion_loss, diff_ref, rtol=5e-2, atol=1e-6), (
        diffusion_loss, diff_ref)

    print("KERNEL_OK")
</pallas_src>

<mosaic_0001>
module attributes {stable_mosaic.version = 11 : i64} {
  func.func @_fused_token_kernel(%arg0: i32, %arg1: i32, %arg2: memref<1xf32, #tpu.memory_space<smem>>, %arg3: memref<1x8x768xbf16, #tpu.memory_space<vmem>>, %arg4: memref<1x8x1xi32, #tpu.memory_space<vmem>>, %arg5: memref<1x8x1xf32, #tpu.memory_space<vmem>>, %arg6: memref<1x8x1xi32, #tpu.memory_space<vmem>>, %arg7: memref<1x1x128xf32, #tpu.memory_space<vmem>>, %arg8: memref<128x128xbf16, #tpu.memory_space<vmem>>, %arg9: memref<768x128xbf16, #tpu.memory_space<vmem>>, %arg10: memref<1x128xf32, #tpu.memory_space<vmem>>, %arg11: memref<1x1x8x128xf32, #tpu.memory_space<vmem>>) attributes {dimension_semantics = [#tpu.dimension_semantics<parallel>, #tpu.dimension_semantics<parallel>], iteration_bounds = array<i64: 4, 1>, scalar_prefetch = 0 : i64, scratch_operands = 0 : i64, tpu.core_type = #tpu.core_type<tc>, window_params = [{transform_indices = @transform_0, window_bounds = array<i64: 1>}, {transform_indices = @transform_1, window_bounds = array<i64: 1, 8, 768>}, {transform_indices = @transform_2, window_bounds = array<i64: 1, 8, 1>}, {transform_indices = @transform_3, window_bounds = array<i64: 1, 8, 1>}, {transform_indices = @transform_4, window_bounds = array<i64: 1, 8, 1>}, {transform_indices = @transform_5, window_bounds = array<i64: 1, 1, 128>}, {pipeline_mode = #tpu.pipeline_mode<synchronous>, transform_indices = @transform_6, window_bounds = array<i64: 128, 128>}, {pipeline_mode = #tpu.pipeline_mode<synchronous>, transform_indices = @transform_7, window_bounds = array<i64: 768, 128>}, {pipeline_mode = #tpu.pipeline_mode<synchronous>, transform_indices = @transform_8, window_bounds = array<i64: 1, 128>}, {transform_indices = @transform_9, window_bounds = array<i64: 1, 1, 8, 128>}]} {
    %c0 = arith.constant 0 : index
    %0 = memref.load %arg2[%c0] : memref<1xf32, #tpu.memory_space<smem>>
    %c0_0 = arith.constant 0 : index
    %c0_1 = arith.constant 0 : index
    %c0_2 = arith.constant 0 : index
    %1 = vector.load %arg3[%c0_0, %c0_1, %c0_2] : memref<1x8x768xbf16, #tpu.memory_space<vmem>>, vector<1x8x768xbf16>
    %2 = vector.shape_cast %1 : vector<1x8x768xbf16> to vector<8x768xbf16>
    %3 = arith.extf %2 : vector<8x768xbf16> to vector<8x768xf32>
    %cst = arith.constant dense<0xFF800000> : vector<8xf32>
    %4 = vector.multi_reduction <maximumf>, %3, %cst [1] : vector<8x768xf32> to vector<8xf32>
    %5 = vector.shape_cast %4 : vector<8xf32> to vector<8x1xf32>
    %6 = vector.broadcast %5 : vector<8x1xf32> to vector<8x768xf32>
    %7 = arith.subf %3, %6 : vector<8x768xf32>
    %8 = math.exp %7 : vector<8x768xf32>
    %cst_3 = arith.constant dense<0.000000e+00> : vector<8xf32>
    %9 = vector.multi_reduction <add>, %8, %cst_3 [1] : vector<8x768xf32> to vector<8xf32>
    %10 = vector.shape_cast %9 : vector<8xf32> to vector<8x1xf32>
    %11 = tpu.reciprocal %10 {approx = true} : vector<8x1xf32> -> vector<8x1xf32>
    %12 = vector.broadcast %0 : f32 to vector<8x1xf32>
    %13 = arith.mulf %12, %11 : vector<8x1xf32>
    %14 = vector.broadcast %13 : vector<8x1xf32> to vector<8x768xf32>
    %15 = arith.mulf %8, %14 : vector<8x768xf32>
    %c0_4 = arith.constant 0 : index
    %c0_5 = arith.constant 0 : index
    %c0_6 = arith.constant 0 : index
    %16 = vector.load %arg4[%c0_4, %c0_5, %c0_6] : memref<1x8x1xi32, #tpu.memory_space<vmem>>, vector<1x8x1xi32>
    %17 = vector.shape_cast %16 : vector<1x8x1xi32> to vector<8x1xi32>
    %18 = tpu.iota {dimensions = array<i32: 1>} : vector<8x128xi32>
    %19 = vector.broadcast %17 : vector<8x1xi32> to vector<8x128xi32>
    %20 = arith.cmpi eq, %18, %19 : vector<8x128xi32>
    %21 = arith.extui %20 : vector<8x128xi1> to vector<8x128xi32>
    %22 = arith.sitofp %21 : vector<8x128xi32> to vector<8x128xf32>
    %23 = arith.truncf %22 : vector<8x128xf32> to vector<8x128xbf16>
    %c0_7 = arith.constant 0 : index
    %c0_8 = arith.constant 0 : index
    %24 = vector.load %arg8[%c0_7, %c0_8] : memref<128x128xbf16, #tpu.memory_space<vmem>>, vector<128x128xbf16>
    %cst_9 = arith.constant dense<0.000000e+00> : vector<8x128xf32>
    %25 = tpu.matmul %23, %24, %cst_9 {dimension_numbers = #tpu.dot_dimension_numbers<[1], [0], [0], [1], [0, 0, 1, 1], [], []>} : vector<8x128xbf16>, vector<128x128xbf16>, vector<8x128xf32> -> vector<8x128xf32>
    %26 = arith.truncf %15 : vector<8x768xf32> to vector<8x768xbf16>
    %c0_10 = arith.constant 0 : index
    %c0_11 = arith.constant 0 : index
    %27 = vector.load %arg9[%c0_10, %c0_11] : memref<768x128xbf16, #tpu.memory_space<vmem>>, vector<768x128xbf16>
    %cst_12 = arith.constant dense<0.000000e+00> : vector<8x128xf32>
    %28 = tpu.matmul %26, %27, %cst_12 {dimension_numbers = #tpu.dot_dimension_numbers<[1], [0], [0], [1], [0, 0, 1, 1], [], []>} : vector<8x768xbf16>, vector<768x128xbf16>, vector<8x128xf32> -> vector<8x128xf32>
    %29 = arith.addf %25, %28 : vector<8x128xf32>
    %c0_13 = arith.constant 0 : index
    %c0_14 = arith.constant 0 : index
    %c0_15 = arith.constant 0 : index
    %30 = vector.load %arg7[%c0_13, %c0_14, %c0_15] : memref<1x1x128xf32, #tpu.memory_space<vmem>>, vector<1x1x128xf32>
    %31 = vector.shape_cast %30 : vector<1x1x128xf32> to vector<1x128xf32>
    %32 = vector.broadcast %31 : vector<1x128xf32> to vector<8x128xf32>
    %33 = arith.addf %29, %32 : vector<8x128xf32>
    %c0_16 = arith.constant 0 : index
    %c0_17 = arith.constant 0 : index
    %c0_18 = arith.constant 0 : index
    %34 = vector.load %arg5[%c0_16, %c0_17, %c0_18] : memref<1x8x1xf32, #tpu.memory_space<vmem>>, vector<1x8x1xf32>
    %35 = vector.shape_cast %34 : vector<1x8x1xf32> to vector<8x1xf32>
    %36 = vector.broadcast %35 : vector<8x1xf32> to vector<8x128xf32>
    %37 = arith.mulf %33, %36 : vector<8x128xf32>
    %c0_19 = arith.constant 0 : index
    %c0_20 = arith.constant 0 : index
    %38 = vector.load %arg10[%c0_19, %c0_20] : memref<1x128xf32, #tpu.memory_space<vmem>>, vector<1x128xf32>
    %39 = vector.broadcast %38 : vector<1x128xf32> to vector<8x128xf32>
    %40 = arith.addf %37, %39 : vector<8x128xf32>
    %c0_21 = arith.constant 0 : index
    %c0_22 = arith.constant 0 : index
    %c0_23 = arith.constant 0 : index
    %41 = vector.load %arg6[%c0_21, %c0_22, %c0_23] : memref<1x8x1xi32, #tpu.memory_space<vmem>>, vector<1x8x1xi32>
    %42 = vector.shape_cast %41 : vector<1x8x1xi32> to vector<8x1xi32>
    %cst_24 = arith.constant dense<0xFF800000> : vector<8xf32>
    %43 = vector.multi_reduction <maximumf>, %40, %cst_24 [1] : vector<8x128xf32> to vector<8xf32>
    %44 = vector.shape_cast %43 : vector<8xf32> to vector<8x1xf32>
    %45 = vector.broadcast %44 : vector<8x1xf32> to vector<8x128xf32>
    %46 = arith.subf %40, %45 : vector<8x128xf32>
    %47 = math.exp %46 : vector<8x128xf32>
    %cst_25 = arith.constant dense<0.000000e+00> : vector<8xf32>
    %48 = vector.multi_reduction <add>, %47, %cst_25 [1] : vector<8x128xf32> to vector<8xf32>
    %49 = vector.shape_cast %48 : vector<8xf32> to vector<8x1xf32>
    %50 = math.log %49 : vector<8x1xf32>
    %51 = tpu.iota {dimensions = array<i32: 1>} : vector<8x128xi32>
    %52 = vector.broadcast %42 : vector<8x1xi32> to vector<8x128xi32>
    %53 = arith.cmpi eq, %51, %52 : vector<8x128xi32>
    %cst_26 = arith.constant 0.000000e+00 : f32
    %54 = vector.broadcast %cst_26 : f32 to vector<8x128xf32>
    %55 = arith.select %53, %46, %54 : vector<8x128xi1>, vector<8x128xf32>
    %cst_27 = arith.constant dense<0.000000e+00> : vector<8xf32>
    %56 = vector.multi_reduction <add>, %55, %cst_27 [1] : vector<8x128xf32> to vector<8xf32>
    %57 = vector.shape_cast %56 : vector<8xf32> to vector<8x1xf32>
    %c0_i32 = arith.constant 0 : i32
    %58 = vector.broadcast %c0_i32 : i32 to vector<8x1xi32>
    %59 = arith.cmpi ne, %42, %58 : vector<8x1xi32>
    %60 = arith.extui %59 : vector<8x1xi1> to vector<8x1xi32>
    %61 = arith.sitofp %60 : vector<8x1xi32> to vector<8x1xf32>
    %62 = arith.subf %57, %50 : vector<8x1xf32>
    %63 = arith.mulf %62, %61 : vector<8x1xf32>
    %64 = vector.shape_cast %63 : vector<8x1xf32> to vector<1x8x1xf32>
    %cst_28 = arith.constant dense<0.000000e+00> : vector<1xf32>
    %65 = vector.multi_reduction <add>, %64, %cst_28 [1, 2] : vector<1x8x1xf32> to vector<1xf32>
    %66 = vector.shape_cast %65 : vector<1xf32> to vector<1x1x1xf32>
    %67 = vector.extract %66[0, 0, 0] : f32 from vector<1x1x1xf32>
    %cst_29 = arith.constant 0.000000e+00 : f32
    %68 = arith.subf %cst_29, %67 : f32
    %69 = vector.shape_cast %61 : vector<8x1xf32> to vector<1x8x1xf32>
    %cst_30 = arith.constant dense<0.000000e+00> : vector<1xf32>
    %70 = vector.multi_reduction <add>, %69, %cst_30 [1, 2] : vector<1x8x1xf32> to vector<1xf32>
    %71 = vector.shape_cast %70 : vector<1xf32> to vector<1x1x1xf32>
    %72 = vector.extract %71[0, 0, 0] : f32 from vector<1x1x1xf32>
    %73 = tpu.iota {dimensions = array<i32: 0>} : vector<8x128xi32>
    %c0_i32_31 = arith.constant 0 : i32
    %74 = vector.broadcast %c0_i32_31 : i32 to vector<8x128xi32>
    %75 = arith.cmpi eq, %73, %74 : vector<8x128xi32>
    %c1_i32 = arith.constant 1 : i32
    %76 = vector.broadcast %c1_i32 : i32 to vector<8x128xi32>
    %77 = arith.cmpi eq, %73, %76 : vector<8x128xi32>
    %cst_32 = arith.constant 0.000000e+00 : f32
    %78 = vector.broadcast %72 : f32 to vector<8x128xf32>
    %79 = vector.broadcast %cst_32 : f32 to vector<8x128xf32>
    %80 = arith.select %77, %78, %79 : vector<8x128xi1>, vector<8x128xf32>
    %81 = vector.broadcast %68 : f32 to vector<8x128xf32>
    %82 = arith.select %75, %81, %80 : vector<8x128xi1>, vector<8x128xf32>
    %c0_33 = arith.constant 0 : index
    %c0_34 = arith.constant 0 : index
    %c0_35 = arith.constant 0 : index
    %c0_36 = arith.constant 0 : index
    %83 = vector.load %arg11[%c0_33, %c0_34, %c0_35, %c0_36] : memref<1x1x8x128xf32, #tpu.memory_space<vmem>>, vector<1x1x8x128xf32>
    %84 = vector.shape_cast %83 : vector<1x1x8x128xf32> to vector<8x128xf32>
    %85 = vector.shape_cast %82 : vector<8x128xf32> to vector<1x1x8x128xf32>
    tpu.vector_store %arg11[%c0_33, %c0_34, %c0_35, %c0_36], %85 {strides = array<i32>} : memref<1x1x8x128xf32, #tpu.memory_space<vmem>>, vector<1x1x8x128xf32>,
    return
  }
  func.func @transform_0(%arg0: i32, %arg1: i32) -> i32 {
    %c0_i32 = arith.constant 0 : i32
    %c0_i32_0 = arith.constant 0 : i32
    return %c0_i32 : i32
  }
  func.func @transform_1(%arg0: i32, %arg1: i32) -> (i32, i32, i32) {
    %c0_i32 = arith.constant 0 : i32
    %c0_i32_0 = arith.constant 0 : i32
    return %arg0, %arg1, %c0_i32 : i32, i32, i32
  }
  func.func @transform_2(%arg0: i32, %arg1: i32) -> (i32, i32, i32) {
    %c0_i32 = arith.constant 0 : i32
    %c0_i32_0 = arith.constant 0 : i32
    return %arg0, %arg1, %c0_i32 : i32, i32, i32
  }
  func.func @transform_3(%arg0: i32, %arg1: i32) -> (i32, i32, i32) {
    %c0_i32 = arith.constant 0 : i32
    %c0_i32_0 = arith.constant 0 : i32
    return %arg0, %arg1, %c0_i32 : i32, i32, i32
  }
  func.func @transform_4(%arg0: i32, %arg1: i32) -> (i32, i32, i32) {
    %c0_i32 = arith.constant 0 : i32
    %c0_i32_0 = arith.constant 0 : i32
    return %arg0, %arg1, %c0_i32 : i32, i32, i32
  }
  func.func @transform_5(%arg0: i32, %arg1: i32) -> (i32, i32, i32) {
    %c0_i32 = arith.constant 0 : i32
    %c0_i32_0 = arith.constant 0 : i32
    %c0_i32_1 = arith.constant 0 : i32
    return %arg0, %c0_i32, %c0_i32_0 : i32, i32, i32
  }
  func.func @transform_6(%arg0: i32, %arg1: i32) -> (i32, i32) {
    %c0_i32 = arith.constant 0 : i32
    %c0_i32_0 = arith.constant 0 : i32
    %c0_i32_1 = arith.constant 0 : i32
    return %c0_i32, %c0_i32_0 : i32, i32
  }
  func.func @transform_7(%arg0: i32, %arg1: i32) -> (i32, i32) {
    %c0_i32 = arith.constant 0 : i32
    %c0_i32_0 = arith.constant 0 : i32
    %c0_i32_1 = arith.constant 0 : i32
    return %c0_i32, %c0_i32_0 : i32, i32
  }
  func.func @transform_8(%arg0: i32, %arg1: i32) -> (i32, i32) {
    %c0_i32 = arith.constant 0 : i32
    %c0_i32_0 = arith.constant 0 : i32
    %c0_i32_1 = arith.constant 0 : i32
    return %c0_i32, %c0_i32_0 : i32, i32
  }
  func.func @transform_9(%arg0: i32, %arg1: i32) -> (i32, i32, i32, i32) {
    %c0_i32 = arith.constant 0 : i32
    %c0_i32_0 = arith.constant 0 : i32
    %c0_i32_1 = arith.constant 0 : i32
    return %arg0, %arg1, %c0_i32, %c0_i32_0 : i32, i32, i32, i32
  }
}

</mosaic_0001>

<bundles_post_ra>
// kernel: diffusion_forward.1
= control target key start
LH: loop header
LB: loop body
LE: loop exit
PB: predicated region body
PF: predicated region fallthrough
CT: control target
= control target key end

     0   :  { %s1709_s11 = smov 0   ;;  %s1711_s12 = smov 0   ;;  %s1976_s0 = inlined_call_operand.<no memory space> [shape: f32[1], index: 0, kind: input, shape index: {}]   ;;  %s1977_s1 = inlined_call_operand.vmem [shape: bf16[4,8,768], index: 1, kind: input, shape index: {}]   ;;  %s1978_s2 = inlined_call_operand.vmem [shape: s32[4,8,1], index: 2, kind: input, shape index: {}]   ;;  %s1979_s3 = inlined_call_operand.vmem [shape: f32[4,8,1], index: 3, kind: input, shape index: {}]   ;;  %s1980_s4 = inlined_call_operand.vmem [shape: s32[4,8,1], index: 4, kind: input, shape index: {}]   ;;  %s1981_s5 = inlined_call_operand.vmem [shape: f32[4,1,128], index: 5, kind: input, shape index: {}]   ;;  %s1982_s6 = inlined_call_operand.vmem [shape: bf16[128,128], index: 6, kind: input, shape index: {}]   ;;  %s1983_s7 = inlined_call_operand.vmem [shape: bf16[768,128], index: 7, kind: input, shape index: {}]   ;;  %s1984_s8 = inlined_call_operand.vmem [shape: f32[1,128], index: 8, kind: input, shape index: {}]   ;;  %s1985_s9 = inlined_call_operand.vmem [shape: f32[4,1,8,128], index: 9, kind: output, shape index: {}]  }
   0x1   :  { %14 = sst [smem:[#allocation2]] %s1976_s0  ;;  %s1713_s13 = smov 0  }
   0x2 LB: > { %s32_s0 = sadd.s32 1, %s1646_s12  ;;  %p1354_p0 = scmp.ge.s32.totalorder %s1650_s13, 1  ;;  %s1650_s13 = sphi %s1713_s13, %s20_s13   ;;  %s1646_s12 = sphi %s1711_s12, %s1987_s12   ;;  %s1642_s11 = sphi %s1709_s11, %s1986_s11  }
   0x3   : > { %p34_p1 = scmp.ge.s32.totalorder %s32_s0, 4  ;;  %p358_p2 = scmp.lt.s32.totalorder %s1650_s13, 5 }
   0x5   : > { %s1989_s0 = smov (%p34_p1, %s32_s0), 0  ;;  %p359_p3 = pnand %p1354_p0, %p358_p2 }
   0x6   : > { %p424_p4 = scmp.lt.s32.totalorder (!%p359_p3), %s1642_s11, 3  ;;  %v1554_v14 = vld [vmem:[%s1983_s7 + $0x40] sm:$0xff] (!%p359_p3)   ;;  %v1652_v17 = vmov (!%p359_p3), 0   ;;  %v1558_v19 = vld [vmem:[%s1983_s7 + $0x48] sm:$0xff] (!%p359_p3)   ;;  %v1562_v25 = vld [vmem:[%s1983_s7 + $0x50] sm:$0xff] (!%p359_p3)   ;;  %s465_s26 = sld [smem:[#allocation2]] (!%p359_p3) }
   0x7   : > { %362 = sbr.rel (%p359_p3) target bundleno = 1142 (0x476), region = 56  ;;  %v1555_v15 = vld [vmem:[%s1983_s7] sm:$0xff] (!%p359_p3)   ;;  %1552 = vset.pattern.permute.xlu1 (!%p359_p3), %v1652_v17  ;;  %1553 = vset.pattern.permute.xlu0 (!%p359_p3), %v1652_v17  ;;  %v1560_v21 = vld [vmem:[%s1983_s7 + $0xc8] sm:$0xff] (!%p359_p3)   ;;  %v1564_v26 = vld [vmem:[%s1983_s7 + $0xd0] sm:$0xff] (!%p359_p3)   ;;  %vm1654_vm0 = vmmov (!%p359_p3), 0   ;;  %vm1185_vm5 = vcmask (!%p359_p3), 7168  }
   0x8   : > { %v1556_v16 = vld [vmem:[%s1983_s7 + $0xc0] sm:$0xff] (!%p359_p3)   ;;  %1424 = vmatprep.subr.bf16.mxu0 (!%p359_p3), %v1554_v14  ;;  %v1559_v22 = vld [vmem:[%s1983_s7 + $0x8] sm:$0xff] (!%p359_p3)   ;;  %v1563_v27 = vld [vmem:[%s1983_s7 + $0x10] sm:$0xff] (!%p359_p3)  }
   0x9   : > { %v1557_v18 = vld [vmem:[%s1983_s7 + $0x80] sm:$0xff] (!%p359_p3)   ;;  %1446 = vmatprep.subr.bf16.mxu1 (!%p359_p3), %v1556_v16  ;;  %1425 = vmatpush3.bf16.msra.mxu0 (!%p359_p3), %v1555_v15  ;;  %v1561_v24 = vld [vmem:[%s1983_s7 + $0x88] sm:$0xff] (!%p359_p3)   ;;  %v1565_v29 = vld [vmem:[%s1983_s7 + $0x90] sm:$0xff] (!%p359_p3)  }
   0xa   : > { %1447 = vmatpush3.bf16.msra.mxu1 (!%p359_p3), %v1557_v18  ;;  %1426 = vmatprep.subr.bf16.mxu0 (!%p359_p3), %v1558_v19  ;;  %v1566_v30 = vld [vmem:[%s1983_s7 + $0x58] sm:$0xff] (!%p359_p3)   ;;  %v1570_v58 = vld [vmem:[%s1983_s7 + $0x60] sm:$0xff] (!%p359_p3)   ;;  %v1574_v62 = vld [vmem:[%s1983_s7 + $0x68] sm:$0xff] (!%p359_p3)  }
   0xb   : > { %1448 = vmatprep.subr.bf16.mxu1 (!%p359_p3), %v1560_v21  ;;  %v1568_v31 = vld [vmem:[%s1983_s7 + $0xd8] sm:$0xff] (!%p359_p3)   ;;  %v1571_v59 = vld [vmem:[%s1983_s7 + $0x20] sm:$0xff] (!%p359_p3)   ;;  %v1575_v63 = vld [vmem:[%s1983_s7 + $0x28] sm:$0xff] (!%p359_p3)  }
   0xc   : > { %v1567_v32 = vld [vmem:[%s1983_s7 + $0x18] sm:$0xff] (!%p359_p3)   ;;  %v1572_v60 = vld [vmem:[%s1983_s7 + $0xe0] sm:$0xff] (!%p359_p3)  }
   0xd   : > { %1427 = vmatpush3.bf16.msra.mxu0 (!%p359_p3), %v1559_v22  ;;  %v1569_v33 = vld [vmem:[%s1983_s7 + $0x98] sm:$0xff] (!%p359_p3)   ;;  %v1573_v61 = vld [vmem:[%s1983_s7 + $0xa0] sm:$0xff] (!%p359_p3)  }
   0xe   : > { %s1991_s11 = smov (!%p424_p4, %s1642_s11), 3  ;;  %1449 = vmatpush3.bf16.msra.mxu1 %v1561_v24  ;;  %1428 = vmatprep.subr.bf16.mxu0 %v1562_v25  ;;  %v1587_v25 = vld [vmem:[%s1983_s7 + $0x100] sm:$0xff]  }
   0xf   : > { %s1519_s14 = smul.u32 24, %s1991_s11  ;;  %s1746_s18 = sshll.u32 %s1991_s11, 3  ;;  %1450 = vmatprep.subr.bf16.mxu1 %v1564_v26  ;;  %v1588_v26 = vld [vmem:[%s1982_s6] sm:$0xff]  }
  0x10   : > { %s439_s27 = scalar_lea.vmem %s1978_s2, %s1746_s18  ;;  %s446_s30 = scalar_lea.vmem %s1979_s3, %s1746_s18 }
  0x11   : > { %s432_s17 = scalar_lea.vmem %s1977_s1, %s1519_s14  ;;  %v516_v20 = vld [vmem:[%s439_s27] sm:$0xff]  ;;  %s453_s28 = scalar_lea.vmem %s1980_s4, %s1746_s18  ;;  %1429 = vmatpush3.bf16.msra.mxu0 %v1563_v27  ;;  %v1589_v27 = vld [vmem:[%s1983_s7 + $0x148] sm:$0xff]  }
  0x12   : > { %v1733_v0 = vld [vmem:[%s432_s17] sm:$0xff]  ;;  %v1735_v1 = vld [vmem:[%s432_s17 + $0x8] sm:$0xff]  ;;  %v1737_v2 = vld [vmem:[%s432_s17 + $0x10] sm:$0xff]  ;;  %520 = vperm.xlu1 %1552, %v516_v20   ;;  %1451 = vmatpush3.bf16.msra.mxu1 %v1565_v29  ;;  %s456_s24 = scalar_lea.vmem %s1981_s5, %s1991_s11 }
  0x13   : > { %v469_v3 = vunpack.c.l.bf16 %v1733_v0  ;;  %v470_v4 = vunpack.c.h.bf16 %v1733_v0  ;;  %v471_v5 = vunpack.c.l.bf16 %v1735_v1  ;;  %v472_v6 = vunpack.c.h.bf16 %v1735_v1  ;;  %v1148_v23 = vld [vmem:[%s446_s30] sm:$0xff]  ;;  %1430 = vmatprep.subr.bf16.mxu0 %v1566_v30  ;;  %1452 = vmatprep.subr.bf16.mxu1 %v1568_v31  ;;  %v1576_v0 = vld [vmem:[%s1983_s7 + $0xe8] sm:$0xff]   ;;  %s463_s30 = scalar_lea.vmem %s1985_s9, %s1746_s18 }
  0x14   : > { %v473_v7 = vunpack.c.l.bf16 %v1737_v2  ;;  %v474_v8 = vunpack.c.h.bf16 %v1737_v2  ;;  %v1793_v28 = vld [vmem:[%s453_s28] sm:$0xff]  ;;  %v1577_v1 = vld [vmem:[%s1983_s7 + $0xa8] sm:$0xff]   ;;  %v1578_v2 = vld [vmem:[%s1983_s7 + $0x70] sm:$0xff]  }
  0x15   : > { %v478_v11 = vmax.f32 %v471_v5, %v472_v6  ;;  %1431 = vmatpush3.bf16.msra.mxu0 %v1567_v32  ;;  %v1590_v30 = vld [vmem:[%s1983_s7 + $0x108] sm:$0xff]   ;;  %v1592_v32 = vld [vmem:[%s1983_s7 + $0x150] sm:$0xff]   ;;  %vm1180_vm4 = vcmp.ne.s32.totalorder %v1793_v28, 0 }
  0x16   : > { %v475_v9 = vmax.f32 %v469_v3, %v473_v7  ;;  %v476_v10 = vmax.f32 %v470_v4, %v474_v8  ;;  %1151 = vperm.xlu1 %1552, %v1148_v23   ;;  %1453 = vmatpush3.bf16.msra.mxu1 %v1569_v33  ;;  %v1591_v31 = vld [vmem:[%s1982_s6 + $0x8] sm:$0xff]   ;;  %v1593_v33 = vld [vmem:[%s1983_s7 + $0x110] sm:$0xff]  }
  0x17   : > { %1432 = vmatprep.subr.bf16.mxu0 %v1570_v58  ;;  %1454 = vmatprep.subr.bf16.mxu1 %v1572_v60 }
  0x18   : > { %v477_v12 = vmax.f32 %v475_v9, %v476_v10  ;;  %v1585_v9 = vld [vmem:[%s1983_s7 + $0xb8] sm:$0xff]   ;;  %v1586_v10 = vld [vmem:[%s1983_s7 + $0x140] sm:$0xff]  }
  0x19   : > { %1433 = vmatpush3.bf16.msra.mxu0 %v1571_v59 }
  0x1a   : > { %v479_v13 = vmax.f32 %v477_v12, %v478_v11  ;;  %1174 = vperm.xlu1 %1552, %v1793_v28   ;;  %1455 = vmatpush3.bf16.msra.mxu1 %v1573_v61  ;;  %v1653_v11 = vmov 0.0  }
  0x1b   : > { %1434 = vmatprep.subr.bf16.mxu0 %v1574_v62  ;;  %1456 = vmatprep.subr.bf16.mxu1 %v1576_v0 }
  0x1c   : > { %480 = vmax.xlane.f32.xlu0 %v479_v13  ;;  %v508_v13 = vstv %s465_s26 }
  0x1d   : > { %1435 = vmatpush3.bf16.msra.mxu0 %v1575_v63 }
  0x1e   : > { %1457 = vmatpush3.bf16.msra.mxu1 %v1577_v1  ;;  %1436 = vmatprep.subr.bf16.mxu0 %v1578_v2 }
  0xa9   : > { %v481_v34 = vpop.xlane.xlu0 %480 }
  0xaa   : > { %v482_v35 = vsub.f32 %v469_v3, %v481_v34  ;;  %v483_v36 = vsub.f32 %v470_v4, %v481_v34  ;;  %v484_v37 = vsub.f32 %v471_v5, %v481_v34  ;;  %v485_v38 = vsub.f32 %v472_v6, %v481_v34  ;;  %v1579_v3 = vld [vmem:[%s1983_s7 + $0x30] sm:$0xff]   ;;  %v1582_v6 = vld [vmem:[%s1983_s7 + $0x78] sm:$0xff]  }
  0xab   : > { %v486_v41 = vsub.f32 %v473_v7, %v481_v34  ;;  %v487_v43 = vsub.f32 %v474_v8, %v481_v34  ;;  %v1580_v4 = vld [vmem:[%s1983_s7 + $0xf0] sm:$0xff]   ;;  %v1584_v7 = vld [vmem:[%s1983_s7 + $0xf8] sm:$0xff]   ;;  %1437 = vmatpush3.bf16.msra.mxu0 %v1579_v3 }
  0xac   : > { %v488_v39 = vmul.f32 1.442695, %v482_v35  ;;  %v490_v40 = vmul.f32 1.442695, %v483_v36  ;;  %v492_v42 = vmul.f32 1.442695, %v484_v37  ;;  %1458 = vmatprep.subr.bf16.mxu1 %v1580_v4  ;;  %1438 = vmatprep.subr.bf16.mxu0 %v1582_v6 }
  0xad   : > { %v494_v44 = vmul.f32 1.442695, %v485_v38  ;;  %v496_v45 = vmul.f32 1.442695, %v486_v41  ;;  %v498_v46 = vmul.f32 1.442695, %v487_v43 }
  0xae   : > { %1610 = vpow2.f32 %v488_v39  ;;  %v1581_v5 = vld [vmem:[%s1983_s7 + $0xb0] sm:$0xff]   ;;  %v1583_v8 = vld [vmem:[%s1983_s7 + $0x38] sm:$0xff]   ;;  %v1598_v38 = vld [vmem:[%s1983_s7 + $0x160] sm:$0xff]  }
  0xaf   : > { %1612 = vpow2.f32 %v490_v40  ;;  %1459 = vmatpush3.bf16.msra.mxu1 %v1581_v5  ;;  %1439 = vmatpush3.bf16.msra.mxu0 %v1583_v8  ;;  %v1594_v34 = vld [vmem:[%s1982_s6 + $0x10] sm:$0xff]   ;;  %v1595_v35 = vld [vmem:[%s1983_s7 + $0x158] sm:$0xff]   ;;  %v1599_v39 = vld [vmem:[%s1983_s7 + $0x120] sm:$0xff]  }
  0xb0   : > { %1614 = vpow2.f32 %v492_v42  ;;  %1460 = vmatprep.subr.bf16.mxu1 %v1584_v7  ;;  %1468 = vmatprep.subr.bf16.mxu0 %v1586_v10  ;;  %v1596_v36 = vld [vmem:[%s1983_s7 + $0x118] sm:$0xff]   ;;  %v1600_v40 = vld [vmem:[%s1982_s6 + $0x20] sm:$0xff]   ;;  %v1601_v41 = vld [vmem:[%s1983_s7 + $0x168] sm:$0xff]  }
  0xb1   : > { %1616 = vpow2.f32 %v494_v44  ;;  %v1597_v37 = vld [vmem:[%s1982_s6 + $0x18] sm:$0xff]   ;;  %v1602_v42 = vld [vmem:[%s1983_s7 + $0x128] sm:$0xff]   ;;  %v1604_v44 = vld [vmem:[%s1983_s7 + $0x170] sm:$0xff]  }
  0xb2   : > { %1618 = vpow2.f32 %v496_v45  ;;  %v1603_v43 = vld [vmem:[%s1982_s6 + $0x28] sm:$0xff]   ;;  %v517_v45 = vlaneseq }
  0xb3   : > { %1620 = vpow2.f32 %v498_v46  ;;  %1461 = vmatpush3.bf16.msra.mxu1 %v1585_v9  ;;  %v1605_v46 = vld [vmem:[%s1983_s7 + $0x130] sm:$0xff]  }
  0xb4   : > { %1499 = vmatprep.subr.bf16.mxu1 %v1653_v11 }
  0xb8   : > { %v1611_v47 = vpop.eup %1610 }
  0xb9   : > { %v1613_v48 = vpop.eup %1612 }
  0xba   : > { %v500_v49 = vadd.f32 %v1613_v48, %v1611_v47  ;;  %v1615_v50 = vpop.eup %1614 }
  0xbb   : > { %v1617_v52 = vpop.eup %1616 }
  0xbc   : > { %v501_v51 = vadd.f32 %v1615_v50, %v500_v49  ;;  %v1811_v54 = vpop.eup %1618  ;;  %v518_v49 = vand.u32 127, %v517_v45 }
  0xbd   : > { %v1621_v56 = vpop.eup %1620 }
  0xbe   : > { %v502_v53 = vadd.f32 %v1617_v52, %v501_v51  ;;  %v521_v51 = vpop.permute.xlu1 %520 }
  0xbf   : > { %vm522_vm1 = vcmp.eq.s32.totalorder %v518_v49, %v521_v51 }
  0xc0   : > { %v503_v55 = vadd.f32 %v1811_v54, %v502_v53  ;;  %vm1417_vm2 = vmpackc.low %vm522_vm1, %vm522_vm1 }
  0xc2   : > { %v504_v57 = vadd.f32 %v1621_v56, %v503_v55 }
  0xc4   : > { %505 = vadd.xlane.f32.xlu0 %v504_v57 }
 0x151   : > { %v506_v12 = vpop.xlane.xlu0 %505 }
 0x152   : > { %1622 = vrcp.f32 %v506_v12 }
 0x15c   : > { %v1623_v14 = vpop.eup %1622 }
 0x15d   : > { %v1866_v15 = vmul.f32 %v1623_v14, %v508_v13  ;;  %v1419_v14 = vld [vmem:[%s456_s24] ss:$0 sm:$0xff] }
 0x15f   : > { %v511_v16 = vmul.f32 %v1613_v48, %v1866_v15  ;;  %v513_v17 = vmul.f32 %v1617_v52, %v1866_v15  ;;  %v510_v18 = vmul.f32 %v1611_v47, %v1866_v15  ;;  %v512_v19 = vmul.f32 %v1615_v50, %v1866_v15  ;;  %v1606_v47 = vld [vmem:[%s1982_s6 + $0x30] sm:$0xff]   ;;  %v1607_v48 = vld [vmem:[%s1983_s7 + $0x178] sm:$0xff]  }
 0x160   : > { %v515_v20 = vmul.f32 %v1621_v56, %v1866_v15  ;;  %v1608_v50 = vld [vmem:[%s1983_s7 + $0x138] sm:$0xff]   ;;  %v514_v53 = vmul.f32 %v1811_v54, %v1866_v15  ;;  %v1655_v56 = vmov 1.0|1.0  }
 0x161   : > { %v543_v21 = vpack.c.bf16 %v511_v16, %v511_v16  ;;  %v545_v22 = vpack.c.bf16 %v513_v17, %v513_v17  ;;  %v542_v23 = vpack.c.bf16 %v510_v18, %v510_v18  ;;  %v544_v24 = vpack.c.bf16 %v512_v19, %v512_v19  ;;  %v1609_v52 = vld [vmem:[%s1982_s6 + $0x38] sm:$0xff]   ;;  %v1152_v17 = vpop.permute.xlu1 %1151  ;;  %v1420_v18 = vld [vmem:[%s1984_s8] ss:$0 sm:$0xff] }
 0x162   : > { %v547_v29 = vpack.c.bf16 %v515_v20, %v515_v20  ;;  %v546_v55 = vpack.c.bf16 %v514_v53, %v514_v53 }
 0x163   : > { %964 = vmatprep.mubr.bf16.mxu0 %v543_v21  ;;  %1004 = vmatprep.mubr.bf16.mxu1 %v545_v22 }
 0x164   : > { %965 = vmatmul.mubr.bf16.vlgmr.msra.gmra.mrb[0].mxu0 %v542_v23  ;;  %1005 = vmatmul.mubr.bf16.vlgmr.msra.gmra.mrb[0].mxu1 %v544_v24 }
 0x165   : > { %1469 = vmatpush3.bf16.msra.mxu0 %v1587_v25  ;;  %1044 = vmatprep.mubr.bf16.mxu0 %v547_v29  ;;  %v1175_v21 = vpop.permute.xlu1 %1174 }
 0x166   : > { %1500 = vmatpush3.bf16.msra.mxu1 %v1588_v26  ;;  %1470 = vmatprep.subr.bf16.mxu0 %v1589_v27  ;;  %vm1176_vm3 = vcmp.eq.s32.totalorder %v518_v49, %v1175_v21 }
 0x167   : > { %1501 = vmatprep.subr.bf16.mxu1 %v1653_v11  ;;  %1515 = vmatprep.mubr.msk.bf16.mxu1 %vm1654_vm0, %v1653_v11 }
 0x169   : > { %1471 = vmatpush3.bf16.msra.mxu0 %v1590_v30 }
 0x16a   : > { %1502 = vmatpush3.bf16.msra.mxu1 %v1591_v31  ;;  %1472 = vmatprep.subr.bf16.mxu0 %v1592_v32  ;;  %v1421_v32 = vsel %vm1180_vm4, 1.0, %v1653_v11 }
 0x16b   : > { %1503 = vmatprep.subr.bf16.mxu1 %v1653_v11 }
 0x16d   : > { %1473 = vmatpush3.bf16.msra.mxu0 %v1593_v33 }
 0x16e   : > { %1504 = vmatpush3.bf16.msra.mxu1 %v1594_v34  ;;  %1474 = vmatprep.subr.bf16.mxu0 %v1595_v35 }
 0x16f   : > { %1505 = vmatprep.subr.bf16.mxu1 %v1653_v11 }
 0x171   : > { %1475 = vmatpush3.bf16.msra.mxu0 %v1596_v36  ;;  %v1197_v36 = vsel %vm1185_vm5, %v1421_v32, 0.0 }
 0x172   : > { %1506 = vmatpush3.bf16.msra.mxu1 %v1597_v37  ;;  %1476 = vmatprep.subr.bf16.mxu0 %v1598_v38 }
 0x173   : > { %1507 = vmatprep.subr.bf16.mxu1 %v1653_v11 }
 0x175   : > { %1477 = vmatpush3.bf16.msra.mxu0 %v1599_v39 }
 0x176   : > { %1508 = vmatpush3.bf16.msra.mxu1 %v1600_v40  ;;  %1478 = vmatprep.subr.bf16.mxu0 %v1601_v41 }
 0x177   : > { %1509 = vmatprep.subr.bf16.mxu1 %v1653_v11 }
 0x179   : > { %1479 = vmatpush3.bf16.msra.mxu0 %v1602_v42 }
 0x17a   : > { %1510 = vmatpush3.bf16.msra.mxu1 %v1603_v43  ;;  %1480 = vmatprep.subr.bf16.mxu0 %v1604_v44 }
 0x17b   : > { %1511 = vmatprep.subr.bf16.mxu1 %v1653_v11 }
 0x17d   : > { %1481 = vmatpush3.bf16.msra.mxu0 %v1605_v46 }
 0x17e   : > { %1512 = vmatpush3.bf16.msra.mxu1 %v1606_v47  ;;  %1482 = vmatprep.subr.bf16.mxu0 %v1607_v48 }
 0x17f   : > { %1513 = vmatprep.subr.bf16.mxu1 %v1653_v11 }
 0x181   : > { %1483 = vmatpush3.bf16.msra.mxu0 %v1608_v50  ;;  %v1208_v50 = vshrl.u32 %v517_v45, 7 }
 0x182   : > { %1514 = vmatpush3.bf16.msra.mxu1 %v1609_v52 }
 0x183   : > { %vm1210_vm6 = vcmp.eq.s32.totalorder %v1208_v50, 1  ;;  %vm1209_vm7 = vcmp.eq.s32.totalorder %v1208_v50, 0 }
 0x184   : > { %1045 = vmatmul.mubr.bf16.vlgmr.msra.gmra.mrb[4].mxu0 %v546_v55 }
 0x185   : > { %1516 = vmatmul.mubr.msk.bf16.vlgmr.msra.gmra.mrb[4].mxu1 %vm1417_vm2, %v1655_v56 }
 0x237   : > { %v1440_v57 = vpop.f32.mrb[0].mxu0  ;;  %v1462_v58 = vpop.f32.mrb[0].mxu1 }
 0x238   : > { %v1441_v59 = vpop.f32.mrb[1].mxu0  ;;  %v1463_v60 = vpop.f32.mrb[1].mxu1 }
 0x239   : > { %v1442_v61 = vadd.f32 %v1441_v59, %v1440_v57  ;;  %v1464_v62 = vadd.f32 %v1463_v60, %v1462_v58  ;;  %v1443_v63 = vpop.f32.mrb[2].mxu0  ;;  %v1465_v0 = vpop.f32.mrb[2].mxu1 }
 0x23a   : > { %v1444_v54 = vpop.f32.mrb[3].mxu0  ;;  %v1466_v1 = vpop.f32.mrb[3].mxu1 }
 0x23b   : > { %v1007_v2 = vadd.f32 %v1464_v62, %v1442_v61 }
 0x257   : > { %v1484_v3 = vpop.f32.mrb[4].mxu0 }
 0x258   : > { %v1485_v4 = vpop.f32.mrb[5].mxu0  ;;  %v1134_v5 = vpop.f32.mrb[4].mxu1 }
 0x259   : > { %v1486_v6 = vadd.f32 %v1485_v4, %v1484_v3  ;;  %v1487_v7 = vpop.f32.mrb[6].mxu0  ;;  %v1517_v8 = vpop.f32.mrb[5].mxu1 }
 0x25a   : > { %v1488_v9 = vpop.f32.mrb[7].mxu0  ;;  %v1137_v10 = vpop.f32.mrb[6].mxu1 }
 0x25b   : > { %v1047_v12 = vadd.f32 %v1486_v6, %v1007_v2  ;;  %v1518_v13 = vpop.f32.mrb[7].mxu1 }
 0x25d   : > { %v1135_v15 = vadd.f32 %v1134_v5, %v1047_v12 }
 0x25f   : > { %v1147_v16 = vadd.f32 %v1419_v14, %v1135_v15 }
 0x261   : > { %v1154_v19 = vmul.f32 %v1152_v17, %v1147_v16 }
 0x263   : > { %v1162_v20 = vadd.f32 %v1420_v18, %v1154_v19 }
 0x265   : > { %1164 = vmax.xlane.f32.xlu0 %v1162_v20 }
 0x2f2   : > { %v1165_v22 = vpop.xlane.xlu0 %1164 }
 0x2f3   : > { %v1166_v23 = vsub.f32 %v1162_v20, %v1165_v22 }
 0x2f5   : > { %v1167_v24 = vmul.f32 1.442695, %v1166_v23  ;;  %v1177_v25 = vsel %vm1176_vm3, %v1166_v23, 0.0 }
 0x2f6   : > { %1178 = vadd.xlane.f32.xlu1 %v1177_v25 }
 0x2f7   : > { %1624 = vpow2.f32 %v1167_v24 }
 0x301   : > { %v1625_v26 = vpop.eup %1624 }
 0x302   : > { %1169 = vadd.xlane.f32.xlu0 %v1625_v26 }
 0x383   : > { %v1179_v31 = vpop.xlane.xlu1 %1178 }
 0x38f   : > { %v1170_v27 = vpop.xlane.xlu0 %1169 }
 0x390   : > { %1626 = vlog2.f32 %v1170_v27 }
 0x39a   : > { %v1627_v29 = vpop.eup %1626 }
 0x39b   : > { %v1172_v30 = vmul.f32 0.6931472, %v1627_v29 }
 0x39d   : > { %v1183_v33 = vsub.f32 %v1179_v31, %v1172_v30 }
 0x39f   : > { %v1184_v34 = vmul.f32 %v1421_v32, %v1183_v33 }
 0x3a1   : > { %v1186_v35 = vsel %vm1185_vm5, %v1184_v34, 0.0 }
 0x3a2   : > { %1187 = vadd.xlane.f32.xlu0 %v1186_v35 }
 0x3a6   : > { %1198 = vadd.xlane.f32.xlu0 %v1197_v36 }
 0x42f   : > { %v1188_v37 = vpop.xlane.xlu0 %1187 }
 0x430   : > { %v1189_v38 = vrot.slane %v1188_v37, 4 }
 0x432   : > { %v1190_v39 = vadd.f32 %v1189_v38, %v1188_v37 }
 0x433   : > { %v1199_v40 = vpop.xlane.xlu0 %1198 }
 0x434   : > { %v1191_v41 = vrot.slane %v1190_v39, 2  ;;  %v1200_v42 = vrot.slane %v1199_v40, 4 }
 0x436   : > { %v1201_v43 = vadd.f32 %v1200_v42, %v1199_v40  ;;  %v1192_v28 = vadd.f32 %v1191_v41, %v1190_v39 }
 0x438   : > { %v1202_v44 = vrot.slane %v1201_v43, 2  ;;  %v1193_v46 = vrot.slane %v1192_v28, 1 }
 0x43a   : > { %v1203_v47 = vadd.f32 %v1202_v44, %v1201_v43  ;;  %v1194_v11 = vadd.f32 %v1193_v46, %v1192_v28 }
 0x43c   : > { %1520 = vpush %v1194_v11  ;;  %v1204_v48 = vrot.slane %v1203_v47, 1 }
 0x43e   : > { %v1205_v49 = vadd.f32 %v1204_v48, %v1203_v47 }
 0x440   : > { %1522 = vpush %v1205_v49 }
 0x46d   : > { %s1521_s11 = spop %1520 }
 0x46e   : > { %s1196_s27 = ssub.f32 0.0, %s1521_s11 }
 0x470   : > { %v1213_v52 = vstv %s1196_s27 }
 0x471   : > { %s1523_s28 = spop %1522 }
 0x472   : > { %v1211_v51 = vstv %s1523_s28 }
 0x473   : > { %v1212_v53 = vsel %vm1210_vm6, %v1211_v51, 0.0 }
 0x474   : > { %v1214_v55 = vsel %vm1209_vm7, %v1213_v52, %v1212_v53 }
 0x475   : > { %1215 = vst [vmem:[%s463_s30] sm:$0xff] %v1214_v55 }
 0x476 PF: > { %s20_s13 = sadd.s32 1, %s1650_s13   ;;  %s1986_s11 = smov %s1646_s12 }
 0x477   : > { %p17_p5 = scmp.ge.s32.totalorder %s20_s13, 6   ;;  %s1987_s12 = smov %s1989_s0 }
 0x479   :  { %19 = sbr.rel (!%p17_p5) target bundleno = 2 (0x2), region = 98 }

</bundles_post_ra>
